<compile_context>
chip_gen: v6e
topology: v6e:2x2x1
jax: 0.10.0
libtpu: 0.0.40
codegen_flags: <defaults>
</compile_context>

<pallas_src>
import functools

import jax
import jax.numpy as jnp
from jax.experimental import pallas as pl
from jax.experimental.pallas import tpu as pltpu

LANES = 128


def _round_up(n, m):
    return ((n + m - 1) // m) * m


# ----------------------------------------------------------------------------
# Fused kernel:
#   encoder:  (Linear+BN)+ReLU -> (Linear+BN)+ReLU
#   en_to_la: Linear
#   decoder:  (Linear+BN)+ReLU -> (Linear+BN)+ReLU -> Linear
#   epilogue: masked / segmented softmax over categorical field column ranges
# ----------------------------------------------------------------------------
def _make_kernel(bm, P, cat_segments):
    def kernel(x_ref, w_ref, b_ref, dec_ref):
        biases = b_ref[...]                       # (8, P), rows 0..5 used

        def layer(h, idx, relu):
            y = jnp.dot(h, w_ref[idx], preferred_element_type=jnp.float32)
            y = y + biases[idx:idx + 1, :]        # (1, P) broadcast over rows
            if relu:
                y = jnp.maximum(y, 0.0)
            return y

        h = layer(x_ref[...], 0, True)            # encoder Linear1 (+BN1) + ReLU
        h = layer(h, 1, True)                     # encoder Linear2 (+BN2) + ReLU
        z = layer(h, 2, False)                    # en_to_la
        o = layer(z, 3, True)                     # linear_1 (+batch_normal1) + ReLU
        o = layer(o, 4, True)                     # linear_2 (+batch_normal2) + ReLU
        logits = layer(o, 5, False)               # linear_3

        # Fused per-field softmax while logits are resident in VMEM.
        dec = logits
        col = jax.lax.broadcasted_iota(jnp.int32, (bm, P), 1)
        neg_inf = jnp.float32(-jnp.inf)
        for start, stop in cat_segments:          # static Python loop (few fields)
            mask = (col >= start) & (col < stop)
            masked = jnp.where(mask, logits, neg_inf)
            m = jnp.max(masked, axis=-1, keepdims=True)
            e = jnp.exp(masked - m)               # exp(-inf) = 0 outside the field
            denom = jnp.sum(e, axis=-1, keepdims=True)
            dec = jnp.where(mask, e / denom, dec)

        dec_ref[...] = dec

    return kernel


def run_fwd(x_pad, w_stack, b_stack, cat_segments, bm):
    """x_pad: (B, P) f32, lane-padded. Returns (B, P) decode output."""
    B, P = x_pad.shape
    grid = (B // bm,)
    kernel = _make_kernel(bm, P, cat_segments)
    return pl.pallas_call(
        kernel,
        out_shape=jax.ShapeDtypeStruct((B, P), jnp.float32),
        grid_spec=pltpu.PrefetchScalarGridSpec(
            num_scalar_prefetch=0,
            grid=grid,
            in_specs=[
                pl.BlockSpec((bm, P), lambda i: (i, 0)),          # activations
                pl.BlockSpec(w_stack.shape, lambda i: (0, 0, 0)),  # all weights
                pl.BlockSpec(b_stack.shape, lambda i: (0, 0)),     # all biases
            ],
            out_specs=pl.BlockSpec((bm, P), lambda i: (i, 0)),
        ),
        compiler_params=pltpu.CompilerParams(
            dimension_semantics=("parallel",),
            vmem_limit_bytes=64 * 1024 * 1024,
        ),
    )(x_pad, w_stack, b_stack)


# ----------------------------------------------------------------------------
# Parameter preparation: fold eval-mode BN into the preceding Linear,
# zero-pad every feature dim to 128 lanes, stack into single operands.
# ----------------------------------------------------------------------------
def prepare_params(raw, dims):
    P = _round_up(max(dims), LANES)

    def fold(w, b, bn):
        gamma, beta, mean, var, eps = bn
        scale = gamma / jnp.sqrt(var + eps)
        return w * scale[None, :], b * scale + (beta - mean * scale)

    def pad(w, b):
        wp = jnp.zeros((P, P), jnp.float32).at[: w.shape[0], : w.shape[1]].set(w)
        bp = jnp.zeros((P,), jnp.float32).at[: b.shape[0]].set(b)
        return wp, bp

    layers = [
        fold(raw["w1"], raw["b1"], raw["bn1"]),
        fold(raw["w2"], raw["b2"], raw["bn2"]),
        (raw["wz"], raw["bz"]),
        fold(raw["wd1"], raw["bd1"], raw["bnd1"]),
        fold(raw["wd2"], raw["bd2"], raw["bnd2"]),
        (raw["wd3"], raw["bd3"]),
    ]
    ws, bs = [], []
    for w, b in layers:
        wp, bp = pad(w, b)
        ws.append(wp)
        bs.append(bp)
    w_stack = jnp.stack(ws, axis=0)                               # (6, P, P)
    b_stack = jnp.zeros((8, P), jnp.float32).at[:6].set(jnp.stack(bs))  # (8, P)
    return {"w_stack": w_stack, "b_stack": b_stack}


# ----------------------------------------------------------------------------
# Full forward (jitted): Pallas kernel + decode glue.
# ----------------------------------------------------------------------------
class Field:
    def __init__(self, data_type, dim):
        self.data_type = data_type
        self._dim = dim

    def dim(self):
        return self._dim


def encoder_decoder_forward(x, packed, *, fields, input_dim):
    B = x.shape[0]
    P = packed["w_stack"].shape[-1]

    # static categorical column ranges
    cat_segments = []
    cur = 0
    for f in fields:
        if f.data_type == "Categorical Data":
            cat_segments.append((cur, cur + f.dim()))
            cur += f.dim()
        else:
            cur += 1
    assert cur == input_dim

    # batch tile: largest of these dividing B (keeps >=2 grid steps / TC work
    # at realistic batch sizes); falls back to the whole batch for toy B.
    bm = B
    for cand in (512, 256, 128, 64, 32, 16, 8):
        if B % cand == 0:
            bm = cand
            break

    x_pad = jnp.zeros((B, P), x.dtype).at[:, :input_dim].set(x)
    dec_pad = run_fwd(x_pad, packed["w_stack"], packed["b_stack"],
                      tuple(cat_segments), bm)
    decodes = dec_pad[:, :input_dim]   # softmax on categorical, raw on numerical

    # out_decoders: PyTorch "column union" one-hot quirk (global over batch).
    parts = []
    cur = 0
    for f in fields:
        if f.data_type == "Categorical Data":
            dim = f.dim()
            data = decodes[:, cur:cur + dim]
            max_index = jnp.argmax(data, axis=1)                          # (B,)
            cols_hit = jnp.max(jax.nn.one_hot(max_index, dim, dtype=data.dtype),
                               axis=0)                                    # (dim,)
            parts.append(jnp.broadcast_to(cols_hit[None, :], (B, dim)))
            cur += dim
        else:
            parts.append(decodes[:, cur:cur + 1])
            cur += 1
    out_decoders = jnp.concatenate(parts, axis=1)
    return decodes, out_decoders


# ----------------------------------------------------------------------------
# Pure-JAX reference (unfolded BN, per-field softmax) for correctness check.
# ----------------------------------------------------------------------------
def reference_forward(x, raw, fields, input_dim):
    def bn(h, stats):
        gamma, beta, mean, var, eps = stats
        return (h - mean) / jnp.sqrt(var + eps) * gamma + beta

    h = jnp.maximum(bn(jnp.dot(x, raw["w1"]) + raw["b1"], raw["bn1"]), 0.0)
    h = jnp.maximum(bn(jnp.dot(h, raw["w2"]) + raw["b2"], raw["bn2"]), 0.0)
    z = jnp.dot(h, raw["wz"]) + raw["bz"]
    o = jnp.maximum(bn(jnp.dot(z, raw["wd1"]) + raw["bd1"], raw["bnd1"]), 0.0)
    o = jnp.maximum(bn(jnp.dot(o, raw["wd2"]) + raw["bd2"], raw["bnd2"]), 0.0)
    out = jnp.dot(o, raw["wd3"]) + raw["bd3"]

    B = x.shape[0]
    cur = 0
    decodes, out_dec = [], []
    for f in fields:
        if f.data_type == "Categorical Data":
            dim = f.dim()
            data = jax.nn.softmax(out[:, cur:cur + dim], axis=1)
            decodes.append(data)
            mi = jnp.argmax(data, axis=1)
            cols = jnp.max(jax.nn.one_hot(mi, dim, dtype=data.dtype), axis=0)
            out_dec.append(jnp.broadcast_to(cols[None, :], (B, dim)))
            cur += dim
        else:
            decodes.append(out[:, cur:cur + 1])
            out_dec.append(out[:, cur:cur + 1])
            cur += 1
    return jnp.concatenate(decodes, axis=1), jnp.concatenate(out_dec, axis=1)


# ----------------------------------------------------------------------------
# Deterministic raw parameters (shapes from the module's __init__).
# ----------------------------------------------------------------------------
def init_raw_params(key, input_dim, encoder_dim, encoder_out_dim, latent_dim):
    def linear(k, fan_in, fan_out):
        kw, kb = jax.random.split(k)
        w = jax.random.normal(kw, (fan_in, fan_out), jnp.float32) / jnp.sqrt(fan_in)
        b = 0.1 * jax.random.normal(kb, (fan_out,), jnp.float32)
        return w, b

    def bn_stats(k, dim):
        k1, k2, k3, k4 = jax.random.split(k, 4)
        gamma = 1.0 + 0.1 * jax.random.normal(k1, (dim,), jnp.float32)
        beta = 0.1 * jax.random.normal(k2, (dim,), jnp.float32)
        mean = 0.1 * jax.random.normal(k3, (dim,), jnp.float32)
        var = jax.random.uniform(k4, (dim,), jnp.float32, minval=0.5, maxval=1.5)
        return (gamma, beta, mean, var, 1e-5)

    keys = jax.random.split(key, 10)
    raw = {}
    raw["w1"], raw["b1"] = linear(keys[0], input_dim, encoder_dim)
    raw["bn1"] = bn_stats(keys[1], encoder_dim)
    raw["w2"], raw["b2"] = linear(keys[2], encoder_dim, encoder_out_dim)
    raw["bn2"] = bn_stats(keys[3], encoder_out_dim)
    raw["wz"], raw["bz"] = linear(keys[4], encoder_out_dim, latent_dim)
    raw["wd1"], raw["bd1"] = linear(keys[5], latent_dim, encoder_out_dim)
    raw["bnd1"] = bn_stats(keys[6], encoder_out_dim)
    raw["wd2"], raw["bd2"] = linear(keys[7], encoder_out_dim, encoder_dim)
    raw["bnd2"] = bn_stats(keys[8], encoder_dim)
    raw["wd3"], raw["bd3"] = linear(keys[9], encoder_dim, input_dim)
    return raw


if __name__ == "__main__":
    B = 8
    input_dim, encoder_dim, encoder_out_dim, latent_dim = 16, 32, 24, 8

    fields = [
        Field("Categorical Data", 4),
        Field("Numerical Data", 1),
        Field("Categorical Data", 6),
        Field("Numerical Data", 1),
        Field("Categorical Data", 4),
    ]
    assert sum(f.dim() if f.data_type == "Categorical Data" else 1
               for f in fields) == input_dim

    key = jax.random.PRNGKey(0)
    kx, kp = jax.random.split(key)
    x = jax.random.normal(kx, (B, input_dim), jnp.float32)
    raw = init_raw_params(kp, input_dim, encoder_dim, encoder_out_dim, latent_dim)

    packed = prepare_params(
        raw, (input_dim, encoder_dim, encoder_out_dim, latent_dim))

    fwd = jax.jit(functools.partial(encoder_decoder_forward,
                                    fields=fields, input_dim=input_dim))
    decodes, out_decoders = fwd(x, packed)
    jax.block_until_ready((decodes, out_decoders))

    # sanity check against the pure-JAX (unfolded) reference
    ref_dec, ref_ohe = reference_forward(x, raw, fields, input_dim)
    assert decodes.shape == (B, input_dim)
    assert out_decoders.shape == (B, input_dim)
    assert jnp.allclose(decodes, ref_dec, atol=1e-4, rtol=1e-4)
    assert jnp.allclose(out_decoders, ref_ohe, atol=1e-4, rtol=1e-4)
    print("KERNEL_OK")
</pallas_src>

<mosaic_0001>
module attributes {stable_mosaic.version = 11 : i64} {
  func.func @kernel(%arg0: i32, %arg1: memref<8x128xf32, #tpu.memory_space<vmem>>, %arg2: memref<6x128x128xf32, #tpu.memory_space<vmem>>, %arg3: memref<8x128xf32, #tpu.memory_space<vmem>>, %arg4: memref<8x128xf32, #tpu.memory_space<vmem>>) attributes {dimension_semantics = [#tpu.dimension_semantics<parallel>], iteration_bounds = array<i64: 1>, scalar_prefetch = 0 : i64, scratch_operands = 0 : i64, tpu.core_type = #tpu.core_type<tc>, window_params = [{transform_indices = @transform_0, window_bounds = array<i64: 8, 128>}, {pipeline_mode = #tpu.pipeline_mode<synchronous>, transform_indices = @transform_1, window_bounds = array<i64: 6, 128, 128>}, {pipeline_mode = #tpu.pipeline_mode<synchronous>, transform_indices = @transform_2, window_bounds = array<i64: 8, 128>}, {transform_indices = @transform_3, window_bounds = array<i64: 8, 128>}]} {
    %c0 = arith.constant 0 : index
    %c0_0 = arith.constant 0 : index
    %0 = vector.load %arg3[%c0, %c0_0] : memref<8x128xf32, #tpu.memory_space<vmem>>, vector<8x128xf32>
    %c0_1 = arith.constant 0 : index
    %c0_2 = arith.constant 0 : index
    %1 = vector.load %arg1[%c0_1, %c0_2] : memref<8x128xf32, #tpu.memory_space<vmem>>, vector<8x128xf32>
    %c0_3 = arith.constant 0 : index
    %c0_4 = arith.constant 0 : index
    %c0_5 = arith.constant 0 : index
    %2 = vector.load %arg2[%c0_3, %c0_4, %c0_5] : memref<6x128x128xf32, #tpu.memory_space<vmem>>, vector<1x128x128xf32>
    %3 = vector.shape_cast %2 : vector<1x128x128xf32> to vector<128x128xf32>
    %cst = arith.constant dense<0.000000e+00> : vector<8x128xf32>
    %4 = tpu.matmul %1, %3, %cst {dimension_numbers = #tpu.dot_dimension_numbers<[1], [0], [0], [1], [0, 0, 1, 1], [], []>} : vector<8x128xf32>, vector<128x128xf32>, vector<8x128xf32> -> vector<8x128xf32>
    %5 = vector.extract_strided_slice %0 {offsets = [0, 0], sizes = [1, 128], strides = [1, 1]} : vector<8x128xf32> to vector<1x128xf32>
    %6 = vector.broadcast %5 : vector<1x128xf32> to vector<8x128xf32>
    %7 = arith.addf %4, %6 : vector<8x128xf32>
    %cst_6 = arith.constant 0.000000e+00 : f32
    %8 = vector.broadcast %cst_6 : f32 to vector<8x128xf32>
    %9 = arith.maximumf %7, %8 : vector<8x128xf32>
    %c1 = arith.constant 1 : index
    %c0_7 = arith.constant 0 : index
    %c0_8 = arith.constant 0 : index
    %10 = vector.load %arg2[%c1, %c0_7, %c0_8] : memref<6x128x128xf32, #tpu.memory_space<vmem>>, vector<1x128x128xf32>
    %11 = vector.shape_cast %10 : vector<1x128x128xf32> to vector<128x128xf32>
    %cst_9 = arith.constant dense<0.000000e+00> : vector<8x128xf32>
    %12 = tpu.matmul %9, %11, %cst_9 {dimension_numbers = #tpu.dot_dimension_numbers<[1], [0], [0], [1], [0, 0, 1, 1], [], []>} : vector<8x128xf32>, vector<128x128xf32>, vector<8x128xf32> -> vector<8x128xf32>
    %13 = vector.extract_strided_slice %0 {offsets = [1, 0], sizes = [1, 128], strides = [1, 1]} : vector<8x128xf32> to vector<1x128xf32>
    %14 = vector.broadcast %13 : vector<1x128xf32> to vector<8x128xf32>
    %15 = arith.addf %12, %14 : vector<8x128xf32>
    %cst_10 = arith.constant 0.000000e+00 : f32
    %16 = vector.broadcast %cst_10 : f32 to vector<8x128xf32>
    %17 = arith.maximumf %15, %16 : vector<8x128xf32>
    %c2 = arith.constant 2 : index
    %c0_11 = arith.constant 0 : index
    %c0_12 = arith.constant 0 : index
    %18 = vector.load %arg2[%c2, %c0_11, %c0_12] : memref<6x128x128xf32, #tpu.memory_space<vmem>>, vector<1x128x128xf32>
    %19 = vector.shape_cast %18 : vector<1x128x128xf32> to vector<128x128xf32>
    %cst_13 = arith.constant dense<0.000000e+00> : vector<8x128xf32>
    %20 = tpu.matmul %17, %19, %cst_13 {dimension_numbers = #tpu.dot_dimension_numbers<[1], [0], [0], [1], [0, 0, 1, 1], [], []>} : vector<8x128xf32>, vector<128x128xf32>, vector<8x128xf32> -> vector<8x128xf32>
    %21 = vector.extract_strided_slice %0 {offsets = [2, 0], sizes = [1, 128], strides = [1, 1]} : vector<8x128xf32> to vector<1x128xf32>
    %22 = vector.broadcast %21 : vector<1x128xf32> to vector<8x128xf32>
    %23 = arith.addf %20, %22 : vector<8x128xf32>
    %c3 = arith.constant 3 : index
    %c0_14 = arith.constant 0 : index
    %c0_15 = arith.constant 0 : index
    %24 = vector.load %arg2[%c3, %c0_14, %c0_15] : memref<6x128x128xf32, #tpu.memory_space<vmem>>, vector<1x128x128xf32>
    %25 = vector.shape_cast %24 : vector<1x128x128xf32> to vector<128x128xf32>
    %cst_16 = arith.constant dense<0.000000e+00> : vector<8x128xf32>
    %26 = tpu.matmul %23, %25, %cst_16 {dimension_numbers = #tpu.dot_dimension_numbers<[1], [0], [0], [1], [0, 0, 1, 1], [], []>} : vector<8x128xf32>, vector<128x128xf32>, vector<8x128xf32> -> vector<8x128xf32>
    %27 = vector.extract_strided_slice %0 {offsets = [3, 0], sizes = [1, 128], strides = [1, 1]} : vector<8x128xf32> to vector<1x128xf32>
    %28 = vector.broadcast %27 : vector<1x128xf32> to vector<8x128xf32>
    %29 = arith.addf %26, %28 : vector<8x128xf32>
    %cst_17 = arith.constant 0.000000e+00 : f32
    %30 = vector.broadcast %cst_17 : f32 to vector<8x128xf32>
    %31 = arith.maximumf %29, %30 : vector<8x128xf32>
    %c4 = arith.constant 4 : index
    %c0_18 = arith.constant 0 : index
    %c0_19 = arith.constant 0 : index
    %32 = vector.load %arg2[%c4, %c0_18, %c0_19] : memref<6x128x128xf32, #tpu.memory_space<vmem>>, vector<1x128x128xf32>
    %33 = vector.shape_cast %32 : vector<1x128x128xf32> to vector<128x128xf32>
    %cst_20 = arith.constant dense<0.000000e+00> : vector<8x128xf32>
    %34 = tpu.matmul %31, %33, %cst_20 {dimension_numbers = #tpu.dot_dimension_numbers<[1], [0], [0], [1], [0, 0, 1, 1], [], []>} : vector<8x128xf32>, vector<128x128xf32>, vector<8x128xf32> -> vector<8x128xf32>
    %35 = vector.extract_strided_slice %0 {offsets = [4, 0], sizes = [1, 128], strides = [1, 1]} : vector<8x128xf32> to vector<1x128xf32>
    %36 = vector.broadcast %35 : vector<1x128xf32> to vector<8x128xf32>
    %37 = arith.addf %34, %36 : vector<8x128xf32>
    %cst_21 = arith.constant 0.000000e+00 : f32
    %38 = vector.broadcast %cst_21 : f32 to vector<8x128xf32>
    %39 = arith.maximumf %37, %38 : vector<8x128xf32>
    %c5 = arith.constant 5 : index
    %c0_22 = arith.constant 0 : index
    %c0_23 = arith.constant 0 : index
    %40 = vector.load %arg2[%c5, %c0_22, %c0_23] : memref<6x128x128xf32, #tpu.memory_space<vmem>>, vector<1x128x128xf32>
    %41 = vector.shape_cast %40 : vector<1x128x128xf32> to vector<128x128xf32>
    %cst_24 = arith.constant dense<0.000000e+00> : vector<8x128xf32>
    %42 = tpu.matmul %39, %41, %cst_24 {dimension_numbers = #tpu.dot_dimension_numbers<[1], [0], [0], [1], [0, 0, 1, 1], [], []>} : vector<8x128xf32>, vector<128x128xf32>, vector<8x128xf32> -> vector<8x128xf32>
    %43 = vector.extract_strided_slice %0 {offsets = [5, 0], sizes = [1, 128], strides = [1, 1]} : vector<8x128xf32> to vector<1x128xf32>
    %44 = vector.broadcast %43 : vector<1x128xf32> to vector<8x128xf32>
    %45 = arith.addf %42, %44 : vector<8x128xf32>
    %46 = tpu.iota {dimensions = array<i32: 1>} : vector<8x128xi32>
    %c0_i32 = arith.constant 0 : i32
    %47 = vector.broadcast %c0_i32 : i32 to vector<8x128xi32>
    %48 = arith.cmpi sge, %46, %47 : vector<8x128xi32>
    %c4_i32 = arith.constant 4 : i32
    %49 = vector.broadcast %c4_i32 : i32 to vector<8x128xi32>
    %50 = arith.cmpi slt, %46, %49 : vector<8x128xi32>
    %51 = arith.andi %48, %50 : vector<8x128xi1>
    %cst_25 = arith.constant 0xFF800000 : f32
    %52 = vector.broadcast %cst_25 : f32 to vector<8x128xf32>
    %53 = arith.select %51, %45, %52 : vector<8x128xi1>, vector<8x128xf32>
    %cst_26 = arith.constant dense<0xFF800000> : vector<8xf32>
    %54 = vector.multi_reduction <maximumf>, %53, %cst_26 [1] : vector<8x128xf32> to vector<8xf32>
    %55 = vector.shape_cast %54 : vector<8xf32> to vector<8x1xf32>
    %56 = vector.broadcast %55 : vector<8x1xf32> to vector<8x128xf32>
    %57 = arith.subf %53, %56 : vector<8x128xf32>
    %58 = math.exp %57 : vector<8x128xf32>
    %cst_27 = arith.constant dense<0.000000e+00> : vector<8xf32>
    %59 = vector.multi_reduction <add>, %58, %cst_27 [1] : vector<8x128xf32> to vector<8xf32>
    %60 = vector.shape_cast %59 : vector<8xf32> to vector<8x1xf32>
    %61 = vector.broadcast %60 : vector<8x1xf32> to vector<8x128xf32>
    %62 = arith.divf %58, %61 : vector<8x128xf32>
    %63 = arith.select %51, %62, %45 : vector<8x128xi1>, vector<8x128xf32>
    %c5_i32 = arith.constant 5 : i32
    %64 = vector.broadcast %c5_i32 : i32 to vector<8x128xi32>
    %65 = arith.cmpi sge, %46, %64 : vector<8x128xi32>
    %c11_i32 = arith.constant 11 : i32
    %66 = vector.broadcast %c11_i32 : i32 to vector<8x128xi32>
    %67 = arith.cmpi slt, %46, %66 : vector<8x128xi32>
    %68 = arith.andi %65, %67 : vector<8x128xi1>
    %cst_28 = arith.constant 0xFF800000 : f32
    %69 = vector.broadcast %cst_28 : f32 to vector<8x128xf32>
    %70 = arith.select %68, %45, %69 : vector<8x128xi1>, vector<8x128xf32>
    %cst_29 = arith.constant dense<0xFF800000> : vector<8xf32>
    %71 = vector.multi_reduction <maximumf>, %70, %cst_29 [1] : vector<8x128xf32> to vector<8xf32>
    %72 = vector.shape_cast %71 : vector<8xf32> to vector<8x1xf32>
    %73 = vector.broadcast %72 : vector<8x1xf32> to vector<8x128xf32>
    %74 = arith.subf %70, %73 : vector<8x128xf32>
    %75 = math.exp %74 : vector<8x128xf32>
    %cst_30 = arith.constant dense<0.000000e+00> : vector<8xf32>
    %76 = vector.multi_reduction <add>, %75, %cst_30 [1] : vector<8x128xf32> to vector<8xf32>
    %77 = vector.shape_cast %76 : vector<8xf32> to vector<8x1xf32>
    %78 = vector.broadcast %77 : vector<8x1xf32> to vector<8x128xf32>
    %79 = arith.divf %75, %78 : vector<8x128xf32>
    %80 = arith.select %68, %79, %63 : vector<8x128xi1>, vector<8x128xf32>
    %c12_i32 = arith.constant 12 : i32
    %81 = vector.broadcast %c12_i32 : i32 to vector<8x128xi32>
    %82 = arith.cmpi sge, %46, %81 : vector<8x128xi32>
    %c16_i32 = arith.constant 16 : i32
    %83 = vector.broadcast %c16_i32 : i32 to vector<8x128xi32>
    %84 = arith.cmpi slt, %46, %83 : vector<8x128xi32>
    %85 = arith.andi %82, %84 : vector<8x128xi1>
    %cst_31 = arith.constant 0xFF800000 : f32
    %86 = vector.broadcast %cst_31 : f32 to vector<8x128xf32>
    %87 = arith.select %85, %45, %86 : vector<8x128xi1>, vector<8x128xf32>
    %cst_32 = arith.constant dense<0xFF800000> : vector<8xf32>
    %88 = vector.multi_reduction <maximumf>, %87, %cst_32 [1] : vector<8x128xf32> to vector<8xf32>
    %89 = vector.shape_cast %88 : vector<8xf32> to vector<8x1xf32>
    %90 = vector.broadcast %89 : vector<8x1xf32> to vector<8x128xf32>
    %91 = arith.subf %87, %90 : vector<8x128xf32>
    %92 = math.exp %91 : vector<8x128xf32>
    %cst_33 = arith.constant dense<0.000000e+00> : vector<8xf32>
    %93 = vector.multi_reduction <add>, %92, %cst_33 [1] : vector<8x128xf32> to vector<8xf32>
    %94 = vector.shape_cast %93 : vector<8xf32> to vector<8x1xf32>
    %95 = vector.broadcast %94 : vector<8x1xf32> to vector<8x128xf32>
    %96 = arith.divf %92, %95 : vector<8x128xf32>
    %97 = arith.select %85, %96, %80 : vector<8x128xi1>, vector<8x128xf32>
    %c0_34 = arith.constant 0 : index
    %c0_35 = arith.constant 0 : index
    %98 = vector.load %arg4[%c0_34, %c0_35] : memref<8x128xf32, #tpu.memory_space<vmem>>, vector<8x128xf32>
    tpu.vector_store %arg4[%c0_34, %c0_35], %97 {strides = array<i32>} : memref<8x128xf32, #tpu.memory_space<vmem>>, vector<8x128xf32>,
    return
  }
  func.func @transform_0(%arg0: i32) -> (i32, i32) {
    %c0_i32 = arith.constant 0 : i32
    %c0_i32_0 = arith.constant 0 : i32
    return %arg0, %c0_i32 : i32, i32
  }
  func.func @transform_1(%arg0: i32) -> (i32, i32, i32) {
    %c0_i32 = arith.constant 0 : i32
    %c0_i32_0 = arith.constant 0 : i32
    %c0_i32_1 = arith.constant 0 : i32
    %c0_i32_2 = arith.constant 0 : i32
    return %c0_i32, %c0_i32_0, %c0_i32_1 : i32, i32, i32
  }
  func.func @transform_2(%arg0: i32) -> (i32, i32) {
    %c0_i32 = arith.constant 0 : i32
    %c0_i32_0 = arith.constant 0 : i32
    %c0_i32_1 = arith.constant 0 : i32
    return %c0_i32, %c0_i32_0 : i32, i32
  }
  func.func @transform_3(%arg0: i32) -> (i32, i32) {
    %c0_i32 = arith.constant 0 : i32
    %c0_i32_0 = arith.constant 0 : i32
    return %arg0, %c0_i32 : i32, i32
  }
}

</mosaic_0001>

<bundles_post_ra>
// kernel: encoder_decoder_forward.1
= control target key start
LH: loop header
LB: loop body
LE: loop exit
PB: predicated region body
PF: predicated region fallthrough
CT: control target
= control target key end

     0   :  { %8 = vsyncpa [#allocation3], 0  ;;  %s980_s12 = smov [#allocation2]   ;;  %s1161_s0 = inlined_call_operand.vmem [shape: f32[8,128], index: 0, kind: input, shape index: {}]   ;;  %s1162_s1 = inlined_call_operand.hbm [shape: f32[6,128,128], index: 1, kind: input, shape index: {}]   ;;  %s1163_s2 = inlined_call_operand.vmem [shape: f32[8,128], index: 2, kind: input, shape index: {}]   ;;  %s1164_s3 = inlined_call_operand.vmem [shape: f32[8,128], index: 3, kind: output, shape index: {}]  }
   0x1   :  { %s16_s13 = sshll.u32 %s980_s12, 4  ;;  %s17_s13 = int_to_ptr.vmem [resolvable:$true] %s16_s13 }
   0x2   :  { %s966_s14 = scalar_lea.vmem %s17_s13, 12288  ;;  %p971_p1 = scmp.lt.s32.totalorder %s17_s13, %s17_s13 }
   0x3   :  { %p967_p0 = scmp.ne.s32.totalorder %s17_s13, %s966_s14  ;;  %p972_p2 = scmp.lt.s32.totalorder %s966_s14, %s966_s14 }
   0x5   :  { %p973_p3 = por %p972_p2, %p971_p1 }
   0x7   :  { %p974_p4 = pnand %p973_p3, %p967_p0 }
   0x9   :  { %977 = shalt.err (!%p974_p4)
}
   0xa   :  { %s981_s15 = smov 128   ;;  %s982_s16 = smov 8  }
   0xb   :  { %22 = dma.hbm_to_vmem [thread:$0]  %s1162_s1, 12288, %s17_s13, [#allocation3], %s981_s15, %s981_s15, %s982_s16  }
   0xc   :  { %978 = dma.done.wait [#allocation3], 12288  }
   0xd   :  { %979 = vsyncadd [#allocation3], 4294955008  ;;  %v983_v0 = vmov 0.0   ;;  %vm984_vm0 = vmmov 0   ;;  %v45_v1 = vld [vmem:[#allocation2 + $0x78] sm:$0xff]  ;;  %v44_v2 = vld [vmem:[#allocation2 + $0x70] sm:$0xff]  ;;  %v46_v47 = vlaneseq }
   0xe   :  { %731 = vmatprep.subr.mxu0 %v983_v0  ;;  %763 = vmatprep.mubr.msk.f32.mxu0 %vm984_vm0, %v983_v0  ;;  %v43_v3 = vld [vmem:[#allocation2 + $0x68] sm:$0xff]  ;;  %v42_v4 = vld [vmem:[#allocation2 + $0x60] sm:$0xff]  ;;  %v137_v5 = vld [vmem:[#allocation2 + $0xf8] sm:$0xff] }
   0xf   :  { %766 = vmatprep.subr.mxu1 %v983_v0  ;;  %798 = vmatprep.mubr.msk.f32.mxu1 %vm984_vm0, %v983_v0  ;;  %v41_v6 = vld [vmem:[#allocation2 + $0x58] sm:$0xff]  ;;  %v136_v7 = vld [vmem:[#allocation2 + $0xf0] sm:$0xff]  ;;  %v135_v8 = vld [vmem:[#allocation2 + $0xe8] sm:$0xff]  ;;  %v1065_v48 = vshrl.u32 %v46_v47, 7 }
  0x10   :  { %732 = vmatpush3.msra.mxu0 %v45_v1  ;;  %767 = vmatpush3.msra.mxu1 %v137_v5  ;;  %v40_v9 = vld [vmem:[#allocation2 + $0x50] sm:$0xff]  ;;  %v134_v10 = vld [vmem:[#allocation2 + $0xe0] sm:$0xff]  ;;  %v39_v11 = vld [vmem:[#allocation2 + $0x48] sm:$0xff] }
  0x11   :  { %733 = vmatprep.subr.mxu0 %v983_v0  ;;  %768 = vmatprep.subr.mxu1 %v983_v0  ;;  %v133_v12 = vld [vmem:[#allocation2 + $0xd8] sm:$0xff]  ;;  %v38_v13 = vld [vmem:[#allocation2 + $0x40] sm:$0xff]  ;;  %v132_v14 = vld [vmem:[#allocation2 + $0xd0] sm:$0xff]  ;;  %v48_v49 = vsub.s32 0, %v1065_v48 }
  0x12   :  { %734 = vmatpush3.msra.mxu0 %v44_v2  ;;  %769 = vmatpush3.msra.mxu1 %v136_v7  ;;  %v37_v15 = vld [vmem:[#allocation2 + $0x38] sm:$0xff]  ;;  %v131_v16 = vld [vmem:[#allocation2 + $0xc8] sm:$0xff]  ;;  %v36_v17 = vld [vmem:[#allocation2 + $0x30] sm:$0xff] }
  0x13   :  { %735 = vmatprep.subr.mxu0 %v983_v0  ;;  %770 = vmatprep.subr.mxu1 %v983_v0  ;;  %v130_v18 = vld [vmem:[#allocation2 + $0xc0] sm:$0xff]  ;;  %v35_v19 = vld [vmem:[#allocation2 + $0x28] sm:$0xff]  ;;  %v129_v20 = vld [vmem:[#allocation2 + $0xb8] sm:$0xff] }
  0x14   :  { %736 = vmatpush3.msra.mxu0 %v43_v3  ;;  %771 = vmatpush3.msra.mxu1 %v135_v8  ;;  %v34_v21 = vld [vmem:[#allocation2 + $0x20] sm:$0xff]  ;;  %v128_v22 = vld [vmem:[#allocation2 + $0xb0] sm:$0xff]  ;;  %v33_v23 = vld [vmem:[#allocation2 + $0x18] sm:$0xff] }
  0x15   :  { %737 = vmatprep.subr.mxu0 %v983_v0  ;;  %772 = vmatprep.subr.mxu1 %v983_v0  ;;  %v127_v24 = vld [vmem:[#allocation2 + $0xa8] sm:$0xff]  ;;  %v32_v25 = vld [vmem:[#allocation2 + $0x10] sm:$0xff]  ;;  %v126_v26 = vld [vmem:[#allocation2 + $0xa0] sm:$0xff] }
  0x16   :  { %738 = vmatpush3.msra.mxu0 %v42_v4  ;;  %773 = vmatpush3.msra.mxu1 %v134_v10  ;;  %v31_v27 = vld [vmem:[#allocation2 + $0x8] sm:$0xff]  ;;  %v125_v28 = vld [vmem:[#allocation2 + $0x98] sm:$0xff]  ;;  %v30_v29 = vld [vmem:[#allocation2] sm:$0xff]  ;;  %v140_v10 = vsub.s32 1, %v1065_v48 }
  0x17   :  { %739 = vmatprep.subr.mxu0 %v983_v0  ;;  %774 = vmatprep.subr.mxu1 %v983_v0  ;;  %v29_v30 = vld [vmem:[%s1161_s0] sm:$0xff]  ;;  %v124_v31 = vld [vmem:[#allocation2 + $0x90] sm:$0xff]  ;;  %v123_v32 = vld [vmem:[#allocation2 + $0x88] sm:$0xff] }
  0x18   :  { %740 = vmatpush3.msra.mxu0 %v41_v6  ;;  %775 = vmatpush3.msra.mxu1 %v133_v12  ;;  %v122_v33 = vld [vmem:[#allocation2 + $0x80] sm:$0xff]  ;;  %v229_v34 = vld [vmem:[#allocation2 + $0x178] sm:$0xff]  ;;  %v228_v35 = vld [vmem:[#allocation2 + $0x170] sm:$0xff] }
  0x19   :  { %741 = vmatprep.subr.mxu0 %v983_v0  ;;  %776 = vmatprep.subr.mxu1 %v983_v0  ;;  %v227_v36 = vld [vmem:[#allocation2 + $0x168] sm:$0xff]  ;;  %v226_v37 = vld [vmem:[#allocation2 + $0x160] sm:$0xff]  ;;  %v225_v38 = vld [vmem:[#allocation2 + $0x158] sm:$0xff] }
  0x1a   :  { %742 = vmatpush3.msra.mxu0 %v40_v9  ;;  %777 = vmatpush3.msra.mxu1 %v132_v14  ;;  %v224_v39 = vld [vmem:[#allocation2 + $0x150] sm:$0xff]  ;;  %v223_v40 = vld [vmem:[#allocation2 + $0x148] sm:$0xff]  ;;  %v222_v41 = vld [vmem:[#allocation2 + $0x140] sm:$0xff] }
  0x1b   :  { %743 = vmatprep.subr.mxu0 %v983_v0  ;;  %778 = vmatprep.subr.mxu1 %v983_v0  ;;  %v221_v42 = vld [vmem:[#allocation2 + $0x138] sm:$0xff]  ;;  %v220_v43 = vld [vmem:[#allocation2 + $0x130] sm:$0xff]  ;;  %v219_v44 = vld [vmem:[#allocation2 + $0x128] sm:$0xff] }
  0x1c   :  { %744 = vmatpush3.msra.mxu0 %v39_v11  ;;  %779 = vmatpush3.msra.mxu1 %v131_v16  ;;  %v218_v45 = vld [vmem:[#allocation2 + $0x120] sm:$0xff]  ;;  %v217_v46 = vld [vmem:[#allocation2 + $0x118] sm:$0xff]  ;;  %v216_v56 = vld [vmem:[#allocation2 + $0x110] sm:$0xff] }
  0x1d   :  { %745 = vmatprep.subr.mxu0 %v983_v0  ;;  %780 = vmatprep.subr.mxu1 %v983_v0  ;;  %v1071_v50 = vld [vmem:[%s1163_s2] sm:$0xff]  ;;  %v215_v57 = vld [vmem:[#allocation2 + $0x108] sm:$0xff]  ;;  %v320_v59 = vld [vmem:[#allocation2 + $0x1f8] sm:$0xff] }
  0x1e   :  { %746 = vmatpush3.msra.mxu0 %v38_v13  ;;  %781 = vmatpush3.msra.mxu1 %v130_v18  ;;  %v49_v51 = vrot.slane %v1071_v50, %v48_v49  ;;  %v214_v58 = vld [vmem:[#allocation2 + $0x100] sm:$0xff]  ;;  %v319_v60 = vld [vmem:[#allocation2 + $0x1f0] sm:$0xff]  ;;  %v318_v61 = vld [vmem:[#allocation2 + $0x1e8] sm:$0xff]  ;;  %v141_v11 = vrot.slane %v1071_v50, %v140_v10 }
  0x1f   :  { %747 = vmatprep.subr.mxu0 %v983_v0  ;;  %782 = vmatprep.subr.mxu1 %v983_v0  ;;  %v317_v62 = vld [vmem:[#allocation2 + $0x1e0] sm:$0xff]  ;;  %v316_v63 = vld [vmem:[#allocation2 + $0x1d8] sm:$0xff]  ;;  %v315_v1 = vld [vmem:[#allocation2 + $0x1d0] sm:$0xff] }
  0x20   :  { %748 = vmatpush3.msra.mxu0 %v37_v15  ;;  %783 = vmatpush3.msra.mxu1 %v129_v20  ;;  %v314_v2 = vld [vmem:[#allocation2 + $0x1c8] sm:$0xff]  ;;  %v313_v3 = vld [vmem:[#allocation2 + $0x1c0] sm:$0xff]  ;;  %v312_v4 = vld [vmem:[#allocation2 + $0x1b8] sm:$0xff] }
  0x21   :  { %749 = vmatprep.subr.mxu0 %v983_v0  ;;  %784 = vmatprep.subr.mxu1 %v983_v0  ;;  %v311_v5 = vld [vmem:[#allocation2 + $0x1b0] sm:$0xff]  ;;  %v310_v6 = vld [vmem:[#allocation2 + $0x1a8] sm:$0xff]  ;;  %v309_v7 = vld [vmem:[#allocation2 + $0x1a0] sm:$0xff] }
  0x22   :  { %750 = vmatpush3.msra.mxu0 %v36_v17  ;;  %785 = vmatpush3.msra.mxu1 %v128_v22  ;;  %v308_v8 = vld [vmem:[#allocation2 + $0x198] sm:$0xff]  ;;  %v307_v9 = vld [vmem:[#allocation2 + $0x190] sm:$0xff]  ;;  %v306_v16 = vld [vmem:[#allocation2 + $0x188] sm:$0xff] }
  0x23   :  { %751 = vmatprep.subr.mxu0 %v983_v0  ;;  %786 = vmatprep.subr.mxu1 %v983_v0  ;;  %v305_v17 = vld [vmem:[#allocation2 + $0x180] sm:$0xff]  ;;  %v412_v18 = vld [vmem:[#allocation2 + $0x278] sm:$0xff]  ;;  %v410_v20 = vld [vmem:[#allocation2 + $0x268] sm:$0xff] }
  0x24   :  { %752 = vmatpush3.msra.mxu0 %v35_v19  ;;  %787 = vmatpush3.msra.mxu1 %v127_v24  ;;  %v411_v19 = vld [vmem:[#allocation2 + $0x270] sm:$0xff]  ;;  %v408_v22 = vld [vmem:[#allocation2 + $0x258] sm:$0xff]  ;;  %v406_v24 = vld [vmem:[#allocation2 + $0x248] sm:$0xff] }
  0x25   :  { %753 = vmatprep.subr.mxu0 %v983_v0  ;;  %788 = vmatprep.subr.mxu1 %v983_v0  ;;  %v496_v49 = vld [vmem:[#allocation2 + $0x2b8] sm:$0xff] }
  0x26   :  { %754 = vmatpush3.msra.mxu0 %v34_v21  ;;  %789 = vmatpush3.msra.mxu1 %v126_v26  ;;  %v409_v21 = vld [vmem:[#allocation2 + $0x260] sm:$0xff]  ;;  %v404_v26 = vld [vmem:[#allocation2 + $0x238] sm:$0xff] }
  0x27   :  { %755 = vmatprep.subr.mxu0 %v983_v0  ;;  %790 = vmatprep.subr.mxu1 %v983_v0 }
  0x28   :  { %756 = vmatpush3.msra.mxu0 %v33_v23  ;;  %791 = vmatpush3.msra.mxu1 %v125_v28  ;;  %v407_v23 = vld [vmem:[#allocation2 + $0x250] sm:$0xff]  ;;  %v402_v28 = vld [vmem:[#allocation2 + $0x228] sm:$0xff] }
  0x29   :  { %757 = vmatprep.subr.mxu0 %v983_v0  ;;  %792 = vmatprep.subr.mxu1 %v983_v0 }
  0x2a   :  { %758 = vmatpush3.msra.mxu0 %v32_v25  ;;  %793 = vmatpush3.msra.mxu1 %v124_v31  ;;  %v405_v25 = vld [vmem:[#allocation2 + $0x240] sm:$0xff]  ;;  %v232_v31 = vsub.s32 2, %v1065_v48 }
  0x2b   :  { %759 = vmatprep.subr.mxu0 %v983_v0  ;;  %794 = vmatprep.subr.mxu1 %v983_v0 }
  0x2c   :  { %760 = vmatpush3.msra.mxu0 %v31_v27  ;;  %795 = vmatpush3.msra.mxu1 %v123_v32  ;;  %v403_v27 = vld [vmem:[#allocation2 + $0x230] sm:$0xff]  ;;  %v233_v32 = vrot.slane %v1071_v50, %v232_v31 }
  0x2d   :  { %761 = vmatprep.subr.mxu0 %v983_v0  ;;  %796 = vmatprep.subr.mxu1 %v983_v0 }
  0x2e   :  { %762 = vmatpush3.msra.mxu0 %v30_v29  ;;  %797 = vmatpush3.msra.mxu1 %v122_v33  ;;  %v401_v29 = vld [vmem:[#allocation2 + $0x220] sm:$0xff] }
  0x2f   :  { %764 = vmatmul.mubr.f32.vlgmr.msra.gmra.mxu0 %v29_v30  ;;  %801 = vmatprep.subr.mxu0 %v983_v0  ;;  %v400_v30 = vld [vmem:[#allocation2 + $0x218] sm:$0xff] }
  0x30   :  { %833 = vmatprep.mubr.msk.f32.mxu0 %vm984_vm0, %v983_v0  ;;  %836 = vmatprep.subr.mxu1 %v983_v0 }
  0x31   :  { %802 = vmatpush3.msra.mxu0 %v229_v34 }
  0x32   :  { %803 = vmatprep.subr.mxu0 %v983_v0 }
  0x33   :  { %804 = vmatpush3.msra.mxu0 %v228_v35 }
  0x34   :  { %805 = vmatprep.subr.mxu0 %v983_v0 }
  0x35   :  { %806 = vmatpush3.msra.mxu0 %v227_v36  ;;  %v399_v36 = vld [vmem:[#allocation2 + $0x210] sm:$0xff] }
  0x36   :  { %807 = vmatprep.subr.mxu0 %v983_v0 }
  0x37   :  { %808 = vmatpush3.msra.mxu0 %v226_v37  ;;  %v398_v37 = vld [vmem:[#allocation2 + $0x208] sm:$0xff] }
  0x38   :  { %809 = vmatprep.subr.mxu0 %v983_v0 }
  0x39   :  { %810 = vmatpush3.msra.mxu0 %v225_v38  ;;  %v397_v38 = vld [vmem:[#allocation2 + $0x200] sm:$0xff] }
  0x3a   :  { %811 = vmatprep.subr.mxu0 %v983_v0 }
  0x3b   :  { %812 = vmatpush3.msra.mxu0 %v224_v39  ;;  %v504_v39 = vld [vmem:[#allocation2 + $0x2f8] sm:$0xff] }
  0x3c   :  { %813 = vmatprep.subr.mxu0 %v983_v0 }
  0x3d   :  { %814 = vmatpush3.msra.mxu0 %v223_v40  ;;  %v503_v40 = vld [vmem:[#allocation2 + $0x2f0] sm:$0xff] }
  0x3e   :  { %815 = vmatprep.subr.mxu0 %v983_v0 }
  0x3f   :  { %816 = vmatpush3.msra.mxu0 %v222_v41  ;;  %v502_v41 = vld [vmem:[#allocation2 + $0x2e8] sm:$0xff] }
  0x40   :  { %817 = vmatprep.subr.mxu0 %v983_v0 }
  0x41   :  { %818 = vmatpush3.msra.mxu0 %v221_v42  ;;  %v501_v42 = vld [vmem:[#allocation2 + $0x2e0] sm:$0xff] }
  0x42   :  { %819 = vmatprep.subr.mxu0 %v983_v0 }
  0x43   :  { %820 = vmatpush3.msra.mxu0 %v220_v43  ;;  %v500_v43 = vld [vmem:[#allocation2 + $0x2d8] sm:$0xff] }
  0x44   :  { %821 = vmatprep.subr.mxu0 %v983_v0 }
  0x45   :  { %822 = vmatpush3.msra.mxu0 %v219_v44  ;;  %v499_v44 = vld [vmem:[#allocation2 + $0x2d0] sm:$0xff] }
  0x46   :  { %823 = vmatprep.subr.mxu0 %v983_v0 }
  0x47   :  { %824 = vmatpush3.msra.mxu0 %v218_v45  ;;  %v498_v45 = vld [vmem:[#allocation2 + $0x2c8] sm:$0xff] }
  0x48   :  { %825 = vmatprep.subr.mxu0 %v983_v0 }
  0x49   :  { %826 = vmatpush3.msra.mxu0 %v217_v46  ;;  %v497_v46 = vld [vmem:[#allocation2 + $0x2c0] sm:$0xff] }
  0x4a   :  { %827 = vmatprep.subr.mxu0 %v983_v0 }
  0x4b   :  { %828 = vmatpush3.msra.mxu0 %v216_v56 }
  0x4c   :  { %829 = vmatprep.subr.mxu0 %v983_v0 }
  0x4d   :  { %830 = vmatpush3.msra.mxu0 %v215_v57 }
  0x4e   :  { %831 = vmatprep.subr.mxu0 %v983_v0 }
  0x4f   :  { %832 = vmatpush3.msra.mxu0 %v214_v58 }
  0x50   :  { %871 = vmatprep.subr.mxu0 %v983_v0 }
  0xef   :  { %v116_v52 = vpop.f32.mrf.mxu0 }
  0xf0   :  { %v117_v53 = vadd.f32 %v116_v52, %v49_v51  ;;  %v495_v51 = vld [vmem:[#allocation2 + $0x2b0] sm:$0xff]  ;;  %v494_v52 = vld [vmem:[#allocation2 + $0x2a8] sm:$0xff] }
  0xf1   :  { %v765_v54 = vpop.f32.mrf.mxu0 }
  0xf2   :  { %v120_v55 = vmax.f32 %v117_v53, 0.0  ;;  %v493_v53 = vld [vmem:[#allocation2 + $0x2a0] sm:$0xff]  ;;  %v492_v54 = vld [vmem:[#allocation2 + $0x298] sm:$0xff] }
  0xf4   :  { %799 = vmatmul.mubr.f32.vlgmr.msra.gmra.mxu1 %v120_v55  ;;  %v323_v55 = vsub.s32 3, %v1065_v48 }
  0xf5   :  { %868 = vmatprep.mubr.msk.f32.mxu1 %vm984_vm0, %v983_v0  ;;  %837 = vmatpush3.msra.mxu1 %v320_v59 }
  0xf6   :  { %838 = vmatprep.subr.mxu1 %v983_v0  ;;  %v324_v56 = vrot.slane %v1071_v50, %v323_v55 }
  0xf7   :  { %839 = vmatpush3.msra.mxu1 %v319_v60 }
  0xf8   :  { %840 = vmatprep.subr.mxu1 %v983_v0 }
  0xf9   :  { %841 = vmatpush3.msra.mxu1 %v318_v61  ;;  %v491_v61 = vld [vmem:[#allocation2 + $0x290] sm:$0xff] }
  0xfa   :  { %842 = vmatprep.subr.mxu1 %v983_v0 }
  0xfb   :  { %843 = vmatpush3.msra.mxu1 %v317_v62  ;;  %v490_v62 = vld [vmem:[#allocation2 + $0x288] sm:$0xff] }
  0xfc   :  { %844 = vmatprep.subr.mxu1 %v983_v0 }
  0xfd   :  { %845 = vmatpush3.msra.mxu1 %v316_v63  ;;  %v489_v63 = vld [vmem:[#allocation2 + $0x280] sm:$0xff] }
  0xfe   :  { %846 = vmatprep.subr.mxu1 %v983_v0 }
  0xff   :  { %847 = vmatpush3.msra.mxu1 %v315_v1  ;;  %v415_v1 = vsub.s32 4, %v1065_v48 }
 0x100   :  { %848 = vmatprep.subr.mxu1 %v983_v0 }
 0x101   :  { %849 = vmatpush3.msra.mxu1 %v314_v2  ;;  %v416_v2 = vrot.slane %v1071_v50, %v415_v1 }
 0x102   :  { %850 = vmatprep.subr.mxu1 %v983_v0 }
 0x103   :  { %851 = vmatpush3.msra.mxu1 %v313_v3 }
 0x104   :  { %852 = vmatprep.subr.mxu1 %v983_v0 }
 0x105   :  { %853 = vmatpush3.msra.mxu1 %v312_v4 }
 0x106   :  { %854 = vmatprep.subr.mxu1 %v983_v0 }
 0x107   :  { %855 = vmatpush3.msra.mxu1 %v311_v5 }
 0x108   :  { %856 = vmatprep.subr.mxu1 %v983_v0 }
 0x109   :  { %857 = vmatpush3.msra.mxu1 %v310_v6 }
 0x10a   :  { %858 = vmatprep.subr.mxu1 %v983_v0 }
 0x10b   :  { %859 = vmatpush3.msra.mxu1 %v309_v7  ;;  %v507_v7 = vsub.s32 5, %v1065_v48 }
 0x10c   :  { %860 = vmatprep.subr.mxu1 %v983_v0 }
 0x10d   :  { %861 = vmatpush3.msra.mxu1 %v308_v8  ;;  %v580_v8 = vand.u32 127, %v46_v47 }
 0x10e   :  { %862 = vmatprep.subr.mxu1 %v983_v0 }
 0x10f   :  { %863 = vmatpush3.msra.mxu1 %v307_v9  ;;  %v508_v9 = vrot.slane %v1071_v50, %v507_v7  ;;  %vm609_vm1 = vcmp.ge.s32.totalorder %v580_v8, 12  ;;  %vm610_vm2 = vcmp.lt.s32.totalorder %v580_v8, 16  ;;  %vm582_vm4 = vcmp.lt.s32.totalorder %v580_v8, 4 }
 0x110   :  { %864 = vmatprep.subr.mxu1 %v983_v0  ;;  %vm1140_vm3 = vmand %vm609_vm1, %vm610_vm2  ;;  %vm595_vm5 = vcmp.ge.s32.totalorder %v580_v8, 5  ;;  %vm596_vm6 = vcmp.lt.s32.totalorder %v580_v8, 11 }
 0x111   :  { %865 = vmatpush3.msra.mxu1 %v306_v16  ;;  %vm1147_vm7 = vmand %vm595_vm5, %vm596_vm6 }
 0x112   :  { %866 = vmatprep.subr.mxu1 %v983_v0 }
 0x113   :  { %867 = vmatpush3.msra.mxu1 %v305_v17 }
 0x114   :  { %906 = vmatprep.subr.mxu1 %v983_v0 }
 0x1b4   :  { %v208_v12 = vpop.f32.mrf.mxu1 }
 0x1b5   :  { %v209_v13 = vadd.f32 %v208_v12, %v141_v11 }
 0x1b6   :  { %v800_v14 = vpop.f32.mrf.mxu1 }
 0x1b7   :  { %v212_v15 = vmax.f32 %v209_v13, 0.0 }
 0x1b9   :  { %834 = vmatmul.mubr.f32.vlgmr.msra.gmra.mxu0 %v212_v15 }
 0x1ba   :  { %903 = vmatprep.mubr.msk.f32.mxu0 %vm984_vm0, %v983_v0  ;;  %872 = vmatpush3.msra.mxu0 %v412_v18 }
 0x1bb   :  { %873 = vmatprep.subr.mxu0 %v983_v0 }
 0x1bc   :  { %874 = vmatpush3.msra.mxu0 %v411_v19 }
 0x1bd   :  { %875 = vmatprep.subr.mxu0 %v983_v0 }
 0x1be   :  { %876 = vmatpush3.msra.mxu0 %v410_v20 }
 0x1bf   :  { %877 = vmatprep.subr.mxu0 %v983_v0 }
 0x1c0   :  { %878 = vmatpush3.msra.mxu0 %v409_v21 }
 0x1c1   :  { %879 = vmatprep.subr.mxu0 %v983_v0 }
 0x1c2   :  { %880 = vmatpush3.msra.mxu0 %v408_v22 }
 0x1c3   :  { %881 = vmatprep.subr.mxu0 %v983_v0 }
 0x1c4   :  { %882 = vmatpush3.msra.mxu0 %v407_v23 }
 0x1c5   :  { %883 = vmatprep.subr.mxu0 %v983_v0 }
 0x1c6   :  { %884 = vmatpush3.msra.mxu0 %v406_v24 }
 0x1c7   :  { %885 = vmatprep.subr.mxu0 %v983_v0 }
 0x1c8   :  { %886 = vmatpush3.msra.mxu0 %v405_v25 }
 0x1c9   :  { %887 = vmatprep.subr.mxu0 %v983_v0 }
 0x1ca   :  { %888 = vmatpush3.msra.mxu0 %v404_v26 }
 0x1cb   :  { %889 = vmatprep.subr.mxu0 %v983_v0 }
 0x1cc   :  { %890 = vmatpush3.msra.mxu0 %v403_v27 }
 0x1cd   :  { %891 = vmatprep.subr.mxu0 %v983_v0 }
 0x1ce   :  { %892 = vmatpush3.msra.mxu0 %v402_v28 }
 0x1cf   :  { %893 = vmatprep.subr.mxu0 %v983_v0 }
 0x1d0   :  { %894 = vmatpush3.msra.mxu0 %v401_v29 }
 0x1d1   :  { %895 = vmatprep.subr.mxu0 %v983_v0 }
 0x1d2   :  { %896 = vmatpush3.msra.mxu0 %v400_v30 }
 0x1d3   :  { %897 = vmatprep.subr.mxu0 %v983_v0 }
 0x1d4   :  { %898 = vmatpush3.msra.mxu0 %v399_v36 }
 0x1d5   :  { %899 = vmatprep.subr.mxu0 %v983_v0 }
 0x1d6   :  { %900 = vmatpush3.msra.mxu0 %v398_v37 }
 0x1d7   :  { %901 = vmatprep.subr.mxu0 %v983_v0 }
 0x1d8   :  { %902 = vmatpush3.msra.mxu0 %v397_v38 }
 0x279   :  { %v300_v33 = vpop.f32.mrf.mxu0 }
 0x27a   :  { %v301_v34 = vadd.f32 %v300_v33, %v233_v32 }
 0x27b   :  { %v835_v35 = vpop.f32.mrf.mxu0 }
 0x27c   :  { %869 = vmatmul.mubr.f32.vlgmr.msra.gmra.mxu1 %v301_v34 }
 0x27d   :  { %938 = vmatprep.mubr.msk.f32.mxu1 %vm984_vm0, %v983_v0  ;;  %907 = vmatpush3.msra.mxu1 %v504_v39 }
 0x27e   :  { %908 = vmatprep.subr.mxu1 %v983_v0 }
 0x27f   :  { %909 = vmatpush3.msra.mxu1 %v503_v40 }
 0x280   :  { %910 = vmatprep.subr.mxu1 %v983_v0 }
 0x281   :  { %911 = vmatpush3.msra.mxu1 %v502_v41 }
 0x282   :  { %912 = vmatprep.subr.mxu1 %v983_v0 }
 0x283   :  { %913 = vmatpush3.msra.mxu1 %v501_v42 }
 0x284   :  { %914 = vmatprep.subr.mxu1 %v983_v0 }
 0x285   :  { %915 = vmatpush3.msra.mxu1 %v500_v43 }
 0x286   :  { %916 = vmatprep.subr.mxu1 %v983_v0 }
 0x287   :  { %917 = vmatpush3.msra.mxu1 %v499_v44 }
 0x288   :  { %918 = vmatprep.subr.mxu1 %v983_v0 }
 0x289   :  { %919 = vmatpush3.msra.mxu1 %v498_v45 }
 0x28a   :  { %920 = vmatprep.subr.mxu1 %v983_v0 }
 0x28b   :  { %921 = vmatpush3.msra.mxu1 %v497_v46 }
 0x28c   :  { %922 = vmatprep.subr.mxu1 %v983_v0 }
 0x28d   :  { %923 = vmatpush3.msra.mxu1 %v496_v49 }
 0x28e   :  { %924 = vmatprep.subr.mxu1 %v983_v0 }
 0x28f   :  { %925 = vmatpush3.msra.mxu1 %v495_v51 }
 0x290   :  { %926 = vmatprep.subr.mxu1 %v983_v0 }
 0x291   :  { %927 = vmatpush3.msra.mxu1 %v494_v52 }
 0x292   :  { %928 = vmatprep.subr.mxu1 %v983_v0 }
 0x293   :  { %929 = vmatpush3.msra.mxu1 %v493_v53 }
 0x294   :  { %930 = vmatprep.subr.mxu1 %v983_v0 }
 0x295   :  { %931 = vmatpush3.msra.mxu1 %v492_v54 }
 0x296   :  { %932 = vmatprep.subr.mxu1 %v983_v0 }
 0x297   :  { %933 = vmatpush3.msra.mxu1 %v491_v61 }
 0x298   :  { %934 = vmatprep.subr.mxu1 %v983_v0 }
 0x299   :  { %935 = vmatpush3.msra.mxu1 %v490_v62 }
 0x29a   :  { %936 = vmatprep.subr.mxu1 %v983_v0 }
 0x29b   :  { %937 = vmatpush3.msra.mxu1 %v489_v63 }
 0x33c   :  { %v391_v57 = vpop.f32.mrf.mxu1 }
 0x33d   :  { %v392_v58 = vadd.f32 %v391_v57, %v324_v56 }
 0x33e   :  { %v870_v59 = vpop.f32.mrf.mxu1 }
 0x33f   :  { %v395_v60 = vmax.f32 %v392_v58, 0.0 }
 0x341   :  { %904 = vmatmul.mubr.f32.vlgmr.msra.gmra.mxu0 %v395_v60 }
 0x401   :  { %v483_v3 = vpop.f32.mrf.mxu0 }
 0x402   :  { %v484_v4 = vadd.f32 %v483_v3, %v416_v2 }
 0x403   :  { %v905_v5 = vpop.f32.mrf.mxu0 }
 0x404   :  { %v487_v6 = vmax.f32 %v484_v4, 0.0 }
 0x406   :  { %939 = vmatmul.mubr.f32.vlgmr.msra.gmra.mxu1 %v487_v6 }
 0x4c6   :  { %v575_v0 = vpop.f32.mrf.mxu1 }
 0x4c7   :  { %v576_v11 = vadd.f32 %v575_v0, %v508_v9 }
 0x4c8   :  { %v940_v12 = vpop.f32.mrf.mxu1 }
 0x4c9   :  { %v612_v13 = vsel %vm1140_vm3, %v576_v11, -inf  ;;  %v584_v48 = vsel %vm582_vm4, %v576_v11, -inf  ;;  %v598_v50 = vsel %vm1147_vm7, %v576_v11, -inf }
 0x4ca   :  { %613 = vmax.xlane.f32.xlu1 %v612_v13  ;;  %585 = vmax.xlane.f32.xlu0 %v584_v48 }
 0x4ce   :  { %599 = vmax.xlane.f32.xlu0 %v598_v50 }
 0x553   :  { %v614_v14 = vpop.xlane.xlu1 %613  ;;  %v586_v15 = vpop.xlane.xlu0 %585 }
 0x554   :  { %v587_v16 = vsub.f32 %v584_v48, %v586_v15  ;;  %v615_v17 = vsub.f32 %v612_v13, %v614_v14 }
 0x556   :  { %v588_v18 = vmul.f32 1.442695, %v587_v16  ;;  %v616_v21 = vmul.f32 1.442695, %v615_v17 }
 0x557   :  { %v600_v19 = vpop.xlane.xlu0 %599 }
 0x558   :  { %v601_v20 = vsub.f32 %v598_v50, %v600_v19  ;;  %946 = vpow2.f32 %v588_v18 }
 0x55a   :  { %v602_v22 = vmul.f32 1.442695, %v601_v20 }
 0x55c   :  { %948 = vpow2.f32 %v602_v22 }
 0x55d   :  { %950 = vpow2.f32 %v616_v21 }
 0x565   :  { %v947_v23 = vpop.eup %946 }
 0x566   :  { %590 = vadd.xlane.f32.xlu1 %v947_v23 }
 0x569   :  { %v949_v24 = vpop.eup %948 }
 0x56a   :  { %v951_v25 = vpop.eup %950  ;;  %604 = vadd.xlane.f32.xlu0 %v949_v24 }
 0x56b   :  { %618 = vadd.xlane.f32.xlu1 %v951_v25 }
 0x5ef   :  { %v591_v26 = vpop.xlane.xlu1 %590 }
 0x5f0   :  { %952 = vrcp.f32 %v591_v26 }
 0x5f3   :  { %v605_v27 = vpop.xlane.xlu0 %604 }
 0x5f4   :  { %v619_v28 = vpop.xlane.xlu1 %618  ;;  %954 = vrcp.f32 %v605_v27 }
 0x5f5   :  { %956 = vrcp.f32 %v619_v28 }
 0x5fd   :  { %v953_v29 = vpop.eup %952 }
 0x5fe   :  { %v593_v30 = vmul.f32 %v953_v29, %v947_v23 }
 0x600   :  { %v594_v34 = vsel %vm582_vm4, %v593_v30, %v576_v11 }
 0x601   :  { %v955_v31 = vpop.eup %954 }
 0x602   :  { %v957_v32 = vpop.eup %956  ;;  %v607_v33 = vmul.f32 %v955_v31, %v949_v24 }
 0x603   :  { %v621_v35 = vmul.f32 %v957_v32, %v951_v25 }
 0x604   :  { %v608_v36 = vsel %vm1147_vm7, %v607_v33, %v594_v34 }
 0x605   :  { %v622_v37 = vsel %vm1140_vm3, %v621_v35, %v608_v36 }
 0x606   :  { %623 = vst [vmem:[%s1164_s3] sm:$0xff] %v622_v37 }
 0x607   :  { %628 = vsyncpa [#allocation3], 1 }

</bundles_post_ra>
